<compile_context>
chip_gen: v7x
topology: tpu7x:2x2x1
jax: 0.10.0
libtpu: 0.0.40
codegen_flags: <defaults>
</compile_context>

<pallas_src>
import functools

import jax
import jax.numpy as jnp
from jax import lax
from jax.experimental import pallas as pl
from jax.experimental.pallas import tpu as pltpu


def _round_up(x, m):
    return (x + m - 1) // m * m


def _pcmepp_csd_kernel(two_ns_ref, img_mu_ref, cap_mu_ref, rb_ref, cb_ref,
                       part_ref, *, n1, n2, tm, tn, needs_mask, precision):
    i = pl.program_id(0)      # row tile ("parallel" -> megacore shard on v7x)
    j = pl.program_id(1)      # col tile ("arbitrary" reduction axis)

    # Per-row-tile partial accumulator lives in the output block; the output
    # index_map ignores j so the block stays resident in VMEM across the
    # whole j sweep and is flushed to HBM when i changes.
    @pl.when(j == 0)
    def _():
        part_ref[...] = jnp.zeros_like(part_ref)

    # Gram matmul on the MXU: gram[r, c] = img_mu[r, :] . cap_mu[c, :]
    gram = lax.dot_general(
        img_mu_ref[...], cap_mu_ref[...],
        dimension_numbers=(((1,), (1,)), ((), ())),
        precision=precision,
        preferred_element_type=jnp.float32)                # (tm, tn)

    # Fully fused logits (Gram identity + csd sigma term + scale/shift):
    #   logits = -ns*(||a||^2 - 2 a.b + ||b||^2 + sig_a + sig_b) + shift
    #          = 2*ns*gram + rb + cb
    # rb = -ns*(||a||^2 + sig_a) + shift   (precomputed, pipelined (tm, 1))
    # cb = -ns*(||b||^2 + sig_b)           (precomputed, pipelined (1, tn))
    logits = two_ns_ref[0] * gram + rb_ref[...] + cb_ref[...]

    # Stable softplus == positive part of BCE-with-logits.
    sp = jnp.maximum(logits, 0.0) + jnp.log1p(jnp.exp(-jnp.abs(logits)))

    row_start = i * tm
    col_start = j * tn

    # Slot masks packing the two partial scalars into the lane-dense
    # (1, 8, 128) output block: (0,0)=sum softplus, (0,1)=diag trace.
    sub = lax.broadcasted_iota(jnp.int32, part_ref.shape, 1)
    lane = lax.broadcasted_iota(jnp.int32, part_ref.shape, 2)
    slot_sp = (sub == 0) & (lane == 0)
    slot_tr = (sub == 0) & (lane == 1)

    if needs_mask:
        # Only edge tiles (touching row/col padding) pay for the mask.
        edge = (row_start + tm > n1) | (col_start + tn > n2)

        @pl.when(edge)
        def _():
            gr = row_start + lax.broadcasted_iota(jnp.int32, (tm, tn), 0)
            gc = col_start + lax.broadcasted_iota(jnp.int32, (tm, tn), 1)
            valid = (gr < n1) & (gc < n2)
            s = jnp.sum(jnp.where(valid, sp, 0.0))
            part_ref[...] += jnp.where(slot_sp, s, 0.0)

        @pl.when(jnp.logical_not(edge))
        def _():
            part_ref[...] += jnp.where(slot_sp, jnp.sum(sp), 0.0)
    else:
        part_ref[...] += jnp.where(slot_sp, jnp.sum(sp), 0.0)

    # matched == eye: sum(BCE) = sum(softplus(logits)) - trace(logits), so
    # only tiles crossing the global diagonal contribute the trace term.
    n_diag = min(n1, n2)
    has_diag = (row_start < col_start + tn) & (col_start < row_start + tm)

    @pl.when(has_diag)
    def _():
        gr = row_start + lax.broadcasted_iota(jnp.int32, (tm, tn), 0)
        gc = col_start + lax.broadcasted_iota(jnp.int32, (tm, tn), 1)
        dmask = (gr == gc) & (gr < n_diag)
        tr = jnp.sum(jnp.where(dmask, logits, 0.0))
        part_ref[...] += jnp.where(slot_tr, tr, 0.0)


@functools.partial(jax.jit,
                   static_argnames=("tile_m", "tile_n", "mxu_precision"))
def pcmepp_closed_form_loss(img_mean, img_std, cap_mean, cap_std,
                            negative_scale, shift,
                            *, tile_m=512, tile_n=512,
                            mxu_precision=lax.Precision.HIGHEST):
    """Pallas implementation of ClosedFormSampledDistanceLoss.forward
    (csd path, vib_beta=0, smoothness_alpha=0, matched=None -> identity).

    NOTE: the PyTorch module implicitly requires n1 == n2 (eye target); the
    kernel only places targets on the leading min(n1, n2) diagonal.
    """
    f32 = jnp.float32
    n1, d = img_mean.shape
    n2, d2 = cap_mean.shape
    assert d == d2, "embedding dims must match"

    img_mean = img_mean.astype(f32)
    cap_mean = cap_mean.astype(f32)
    img_std = img_std.astype(f32)
    cap_std = cap_std.astype(f32)
    ns = jnp.reshape(negative_scale.astype(f32), ())
    sh = jnp.reshape(shift.astype(f32), ())

    # ---- O(N*D) per-row / per-col constants (computed once, in XLA) --------
    img_sq = jnp.sum(img_mean * img_mean, axis=-1)        # ||a_i||^2
    cap_sq = jnp.sum(cap_mean * cap_mean, axis=-1)        # ||b_j||^2
    img_sig = jnp.sum(jnp.exp(img_std), axis=-1)          # sum_d exp(std)
    cap_sig = jnp.sum(jnp.exp(cap_std), axis=-1)

    # Aux means computed analytically (exact) -> removed from the kernel.
    inv = 1.0 / float(n1 * n2)
    mu_pdist_mean = (n2 * jnp.sum(img_sq) + n1 * jnp.sum(cap_sq)
                     - 2.0 * jnp.dot(jnp.sum(img_mean, axis=0),
                                     jnp.sum(cap_mean, axis=0))) * inv
    sigma_pdist_mean = (n2 * jnp.sum(img_sig) + n1 * jnp.sum(cap_sig)) * inv

    # Fused per-row / per-col biases (shift folded into the row bias).
    row_bias = -ns * (img_sq + img_sig) + sh               # (N1,)
    col_bias = -ns * (cap_sq + cap_sig)                    # (N2,)

    # ---- tiling -------------------------------------------------------------
    dp = _round_up(d, 128)                                  # lane-dense last dim
    tm = min(_round_up(tile_m, 8), _round_up(n1, 8))        # sublane-aligned
    tn = min(_round_up(tile_n, 128), _round_up(n2, 128))    # lane-aligned

    # VMEM budget: only the two mean tensors are double-buffered through the
    # pipeline; keep everything comfortably inside v7x's 64 MiB physical VMEM
    # (v5e/v6e have 128 MiB, so this budget is safe on every generation).
    def _vmem_est(tm_, tn_):
        return (2 * 2 * (tm_ + tn_) * dp * 4        # double-buffered mean tiles
                + 8 * tm_ * tn_ * 4)                # per-tile f32 temporaries
    budget = 40 * 1024 * 1024
    while _vmem_est(tm, tn) > budget and max(tm, tn) > 128:
        if tn >= tm and tn > 128:
            tn = max(tn // 2, 128)                  # stays a multiple of 128
        else:
            tm = max(_round_up(tm // 2, 8), 8)      # stays a multiple of 8

    n1p = _round_up(n1, tm)
    n2p = _round_up(n2, tn)
    needs_mask = (n1p != n1) or (n2p != n2)
    n_i, n_j = n1p // tm, n2p // tn

    def pad2(x, rows, cols):
        return jnp.pad(x, ((0, rows - x.shape[0]), (0, cols - x.shape[1])))

    img_mu_p = pad2(img_mean, n1p, dp)              # zero-padded (no effect)
    cap_mu_p = pad2(cap_mean, n2p, dp)
    rb_p = pad2(row_bias[:, None], n1p, 1)
    cb_p = pad2(col_bias[None, :], 1, n2p)
    two_ns = jnp.reshape(2.0 * ns, (1,))

    kernel = functools.partial(_pcmepp_csd_kernel, n1=n1, n2=n2, tm=tm, tn=tn,
                               needs_mask=needs_mask, precision=mxu_precision)

    smem_spec = pl.BlockSpec(memory_space=pltpu.MemorySpace.SMEM)
    grid_spec = pltpu.PrefetchScalarGridSpec(
        num_scalar_prefetch=0,
        grid=(n_i, n_j),
        in_specs=[
            smem_spec,                                      # 2 * negative_scale
            pl.BlockSpec((tm, dp), lambda i, j: (i, 0)),    # img mean tile
            pl.BlockSpec((tn, dp), lambda i, j: (j, 0)),    # cap mean tile
            pl.BlockSpec((tm, 1), lambda i, j: (i, 0)),     # fused row bias
            pl.BlockSpec((1, tn), lambda i, j: (0, j)),     # fused col bias
        ],
        # Per-row-tile partials; index map ignores j -> resident accumulator.
        out_specs=pl.BlockSpec((1, 8, 128), lambda i, j: (i, 0, 0)),
    )

    vmem_limit = int(min(max(_vmem_est(tm, tn) + (2 << 20), 32 << 20),
                         64 << 20))

    partials = pl.pallas_call(
        kernel,
        out_shape=jax.ShapeDtypeStruct((n_i, 8, 128), f32),
        grid_spec=grid_spec,
        compiler_params=pltpu.CompilerParams(
            dimension_semantics=("parallel", "arbitrary"),
            vmem_limit_bytes=vmem_limit),
    )(two_ns, img_mu_p, cap_mu_p, rb_p, cb_p)

    # Tiny final combine (also where the v7x per-core partials meet).
    sp_sum = jnp.sum(partials[:, 0, 0])     # sum softplus(logits)
    tr_sum = jnp.sum(partials[:, 0, 1])     # trace(logits) on the eye diagonal
    bce_mean = (sp_sum - tr_sum) * inv
    loss = 2.0 * bce_mean                   # vib_beta == 0

    loss_dict_out = {
        "loss/mu_pdist": mu_pdist_mean,
        "loss/sigma_pdist": sigma_pdist_mean,
        "loss/loss": loss,
        "criterion/shift": shift,
        "criterion/negative_scale": negative_scale,
        "loss/n_pseudo_gts": None,          # smoothness_alpha == 0 path
    }
    return loss, loss_dict_out


def _reference(img_mean, img_std, cap_mean, cap_std, negative_scale, shift):
    """Pure-JAX reference mirroring the PyTorch module (exact broadcast form)."""
    mu_pdist = jnp.sum((img_mean[:, None, :] - cap_mean[None, :, :]) ** 2, -1)
    sigma_pdist = jnp.sum(jnp.exp(img_std)[:, None, :]
                          + jnp.exp(cap_std)[None, :, :], -1)
    logits = -negative_scale * (mu_pdist + sigma_pdist) + shift
    matched = jnp.eye(img_mean.shape[0], dtype=jnp.float32)
    bce = (jnp.maximum(logits, 0.0) - logits * matched
           + jnp.log1p(jnp.exp(-jnp.abs(logits))))
    return 2.0 * jnp.mean(bce), jnp.mean(mu_pdist), jnp.mean(sigma_pdist)


def _check(img_emb, cap_emb, negative_scale, shift, rtol, atol, **kw):
    loss, loss_dict = pcmepp_closed_form_loss(
        img_emb["mean"], img_emb["std"], cap_emb["mean"], cap_emb["std"],
        negative_scale, shift, **kw)
    jax.block_until_ready(loss)
    ref_loss, ref_mu, ref_sig = _reference(
        img_emb["mean"], img_emb["std"], cap_emb["mean"], cap_emb["std"],
        negative_scale[0], shift[0])
    assert jnp.allclose(loss, ref_loss, rtol=rtol, atol=atol), (loss, ref_loss)
    assert jnp.allclose(loss_dict["loss/mu_pdist"], ref_mu,
                        rtol=rtol, atol=atol), (loss_dict["loss/mu_pdist"], ref_mu)
    assert jnp.allclose(loss_dict["loss/sigma_pdist"], ref_sig,
                        rtol=rtol, atol=atol)
    return loss, loss_dict


if __name__ == "__main__":
    # Deterministic parameter init per module __init__: shift=5, negative_scale=5.
    shift = jnp.full((1,), 5.0, dtype=jnp.float32)
    negative_scale = jnp.full((1,), 5.0, dtype=jnp.float32)

    key = jax.random.PRNGKey(0)
    k1, k2, k3, k4, k5, k6, k7, k8 = jax.random.split(key, 8)

    # Test 1: batch=8, hidden=32 -> single tile, lane-padded D and columns.
    N, D = 8, 32
    img_emb = {"mean": jax.random.normal(k1, (N, D), dtype=jnp.float32),
               "std": 0.1 * jax.random.normal(k2, (N, D), dtype=jnp.float32) - 2.0}
    cap_emb = {"mean": jax.random.normal(k3, (N, D), dtype=jnp.float32),
               "std": 0.1 * jax.random.normal(k4, (N, D), dtype=jnp.float32) - 2.0}
    _check(img_emb, cap_emb, negative_scale, shift, rtol=2e-4, atol=1e-4)

    # Test 2: batch=160, hidden=48 with forced 64x128 tiles -> 3x2 grid,
    # row/col padding, edge-tile masking, cross-tile diagonal, per-row partials.
    N2, D2 = 160, 48
    img_emb2 = {"mean": jax.random.normal(k5, (N2, D2), dtype=jnp.float32),
                "std": 0.1 * jax.random.normal(k6, (N2, D2), dtype=jnp.float32) - 2.0}
    cap_emb2 = {"mean": jax.random.normal(k7, (N2, D2), dtype=jnp.float32),
                "std": 0.1 * jax.random.normal(k8, (N2, D2), dtype=jnp.float32) - 2.0}
    _check(img_emb2, cap_emb2, negative_scale, shift, rtol=2e-4, atol=1e-4,
           tile_m=64, tile_n=128)

    # Test 3: validate the single-pass bf16 MXU fast path (Precision.DEFAULT),
    # the documented speed setting for v5e/v6e (Mosaic does not lower HIGH).
    _check(img_emb2, cap_emb2, negative_scale, shift, rtol=2e-2, atol=2e-2,
           tile_m=64, tile_n=128, mxu_precision=lax.Precision.DEFAULT)

    print("KERNEL_OK")
</pallas_src>

<mosaic_0001>
module attributes {stable_mosaic.version = 11 : i64} {
  func.func @_pcmepp_csd_kernel(%arg0: i32, %arg1: i32, %arg2: memref<1xf32, #tpu.memory_space<smem>>, %arg3: memref<8x128xf32, #tpu.memory_space<vmem>>, %arg4: memref<128x128xf32, #tpu.memory_space<vmem>>, %arg5: memref<8x1xf32, #tpu.memory_space<vmem>>, %arg6: memref<1x128xf32, #tpu.memory_space<vmem>>, %arg7: memref<1x8x128xf32, #tpu.memory_space<vmem>>) attributes {dimension_semantics = [#tpu.dimension_semantics<parallel>, #tpu.dimension_semantics<arbitrary>], iteration_bounds = array<i64: 1, 1>, scalar_prefetch = 0 : i64, scratch_operands = 0 : i64, tpu.core_type = #tpu.core_type<tc>, window_params = [{transform_indices = @transform_0, window_bounds = array<i64: 1>}, {transform_indices = @transform_1, window_bounds = array<i64: 8, 128>}, {transform_indices = @transform_2, window_bounds = array<i64: 128, 128>}, {transform_indices = @transform_3, window_bounds = array<i64: 8, 1>}, {transform_indices = @transform_4, window_bounds = array<i64: 1, 128>}, {transform_indices = @transform_5, window_bounds = array<i64: 1, 8, 128>}]} {
    %c0_i32 = arith.constant 0 : i32
    %0 = arith.cmpi eq, %arg1, %c0_i32 : i32
    %1 = arith.extui %0 : i1 to i32
    %c0_i32_0 = arith.constant 0 : i32
    %2 = arith.cmpi ne, %1, %c0_i32_0 : i32
    scf.if %2 {
      %cst_23 = arith.constant 0.000000e+00 : f32
      %54 = vector.broadcast %cst_23 : f32 to vector<1x8x128xf32>
      %c0_24 = arith.constant 0 : index
      %c0_25 = arith.constant 0 : index
      %c0_26 = arith.constant 0 : index
      %55 = vector.load %arg7[%c0_24, %c0_25, %c0_26] : memref<1x8x128xf32, #tpu.memory_space<vmem>>, vector<1x8x128xf32>
      tpu.vector_store %arg7[%c0_24, %c0_25, %c0_26], %54 {strides = array<i32>} : memref<1x8x128xf32, #tpu.memory_space<vmem>>, vector<1x8x128xf32>,
    } else {
    }
    %c0 = arith.constant 0 : index
    %c0_1 = arith.constant 0 : index
    %3 = vector.load %arg3[%c0, %c0_1] : memref<8x128xf32, #tpu.memory_space<vmem>>, vector<8x128xf32>
    %c0_2 = arith.constant 0 : index
    %c0_3 = arith.constant 0 : index
    %4 = vector.load %arg4[%c0_2, %c0_3] : memref<128x128xf32, #tpu.memory_space<vmem>>, vector<128x128xf32>
    %cst = arith.constant dense<0.000000e+00> : vector<8x128xf32>
    %5 = tpu.matmul %3, %4, %cst {dimension_numbers = #tpu.dot_dimension_numbers<[1], [1], [0], [0], [0, 0, 1, 0], [], []>, precision = #tpu.contract_precision<fp32>} : vector<8x128xf32>, vector<128x128xf32>, vector<8x128xf32> -> vector<8x128xf32>
    %c0_4 = arith.constant 0 : index
    %6 = memref.load %arg2[%c0_4] : memref<1xf32, #tpu.memory_space<smem>>
    %7 = vector.broadcast %6 : f32 to vector<8x128xf32>
    %8 = arith.mulf %7, %5 : vector<8x128xf32>
    %c0_5 = arith.constant 0 : index
    %c0_6 = arith.constant 0 : index
    %9 = vector.load %arg5[%c0_5, %c0_6] : memref<8x1xf32, #tpu.memory_space<vmem>>, vector<8x1xf32>
    %10 = vector.broadcast %9 : vector<8x1xf32> to vector<8x128xf32>
    %11 = arith.addf %8, %10 : vector<8x128xf32>
    %c0_7 = arith.constant 0 : index
    %c0_8 = arith.constant 0 : index
    %12 = vector.load %arg6[%c0_7, %c0_8] : memref<1x128xf32, #tpu.memory_space<vmem>>, vector<1x128xf32>
    %13 = vector.broadcast %12 : vector<1x128xf32> to vector<8x128xf32>
    %14 = arith.addf %11, %13 : vector<8x128xf32>
    %cst_9 = arith.constant 0.000000e+00 : f32
    %15 = vector.broadcast %cst_9 : f32 to vector<8x128xf32>
    %16 = arith.maximumf %14, %15 : vector<8x128xf32>
    %17 = math.absf %14 : vector<8x128xf32>
    %cst_10 = arith.constant 0.000000e+00 : f32
    %18 = vector.broadcast %cst_10 : f32 to vector<8x128xf32>
    %19 = arith.subf %18, %17 : vector<8x128xf32>
    %20 = math.exp %19 : vector<8x128xf32>
    %21 = math.log1p %20 : vector<8x128xf32>
    %22 = arith.addf %16, %21 : vector<8x128xf32>
    %c8_i32 = arith.constant 8 : i32
    %23 = arith.muli %arg0, %c8_i32 : i32
    %c128_i32 = arith.constant 128 : i32
    %24 = arith.muli %arg1, %c128_i32 : i32
    %25 = tpu.iota {dimensions = array<i32: 1>} : vector<1x8x128xi32>
    %26 = tpu.iota {dimensions = array<i32: 2>} : vector<1x8x128xi32>
    %c0_i32_11 = arith.constant 0 : i32
    %27 = vector.broadcast %c0_i32_11 : i32 to vector<1x8x128xi32>
    %28 = arith.cmpi eq, %25, %27 : vector<1x8x128xi32>
    %c0_i32_12 = arith.constant 0 : i32
    %29 = vector.broadcast %c0_i32_12 : i32 to vector<1x8x128xi32>
    %30 = arith.cmpi eq, %26, %29 : vector<1x8x128xi32>
    %31 = arith.andi %28, %30 : vector<1x8x128xi1>
    %c0_i32_13 = arith.constant 0 : i32
    %32 = vector.broadcast %c0_i32_13 : i32 to vector<1x8x128xi32>
    %33 = arith.cmpi eq, %25, %32 : vector<1x8x128xi32>
    %c1_i32 = arith.constant 1 : i32
    %34 = vector.broadcast %c1_i32 : i32 to vector<1x8x128xi32>
    %35 = arith.cmpi eq, %26, %34 : vector<1x8x128xi32>
    %36 = arith.andi %33, %35 : vector<1x8x128xi1>
    %c8_i32_14 = arith.constant 8 : i32
    %37 = arith.addi %23, %c8_i32_14 : i32
    %c8_i32_15 = arith.constant 8 : i32
    %38 = arith.cmpi sgt, %37, %c8_i32_15 : i32
    %c128_i32_16 = arith.constant 128 : i32
    %39 = arith.addi %24, %c128_i32_16 : i32
    %c8_i32_17 = arith.constant 8 : i32
    %40 = arith.cmpi sgt, %39, %c8_i32_17 : i32
    %41 = arith.ori %38, %40 : i1
    %42 = arith.extui %41 : i1 to i32
    %c0_i32_18 = arith.constant 0 : i32
    %43 = arith.cmpi ne, %42, %c0_i32_18 : i32
    scf.if %43 {
      %54 = tpu.iota {dimensions = array<i32: 0>} : vector<8x128xi32>
      %55 = vector.broadcast %23 : i32 to vector<8x128xi32>
      %56 = arith.addi %55, %54 : vector<8x128xi32>
      %57 = tpu.iota {dimensions = array<i32: 1>} : vector<8x128xi32>
      %58 = vector.broadcast %24 : i32 to vector<8x128xi32>
      %59 = arith.addi %58, %57 : vector<8x128xi32>
      %c8_i32_23 = arith.constant 8 : i32
      %60 = vector.broadcast %c8_i32_23 : i32 to vector<8x128xi32>
      %61 = arith.cmpi slt, %56, %60 : vector<8x128xi32>
      %c8_i32_24 = arith.constant 8 : i32
      %62 = vector.broadcast %c8_i32_24 : i32 to vector<8x128xi32>
      %63 = arith.cmpi slt, %59, %62 : vector<8x128xi32>
      %64 = arith.andi %61, %63 : vector<8x128xi1>
      %cst_25 = arith.constant 0.000000e+00 : f32
      %65 = vector.broadcast %cst_25 : f32 to vector<8x128xf32>
      %66 = arith.select %64, %22, %65 : vector<8x128xi1>, vector<8x128xf32>
      %67 = vector.shape_cast %66 : vector<8x128xf32> to vector<1x8x128xf32>
      %cst_26 = arith.constant dense<0.000000e+00> : vector<1xf32>
      %68 = vector.multi_reduction <add>, %67, %cst_26 [1, 2] : vector<1x8x128xf32> to vector<1xf32>
      %69 = vector.shape_cast %68 : vector<1xf32> to vector<1x1x1xf32>
      %70 = vector.extract %69[0, 0, 0] : f32 from vector<1x1x1xf32>
      %c0_27 = arith.constant 0 : index
      %c0_28 = arith.constant 0 : index
      %c0_29 = arith.constant 0 : index
      %71 = vector.load %arg7[%c0_27, %c0_28, %c0_29] : memref<1x8x128xf32, #tpu.memory_space<vmem>>, vector<1x8x128xf32>
      %cst_30 = arith.constant 0.000000e+00 : f32
      %72 = vector.broadcast %70 : f32 to vector<1x8x128xf32>
      %73 = vector.broadcast %cst_30 : f32 to vector<1x8x128xf32>
      %74 = arith.select %31, %72, %73 : vector<1x8x128xi1>, vector<1x8x128xf32>
      %75 = arith.addf %71, %74 : vector<1x8x128xf32>
      %c0_31 = arith.constant 0 : index
      %c0_32 = arith.constant 0 : index
      %c0_33 = arith.constant 0 : index
      %76 = vector.load %arg7[%c0_31, %c0_32, %c0_33] : memref<1x8x128xf32, #tpu.memory_space<vmem>>, vector<1x8x128xf32>
      tpu.vector_store %arg7[%c0_31, %c0_32, %c0_33], %75 {strides = array<i32>} : memref<1x8x128xf32, #tpu.memory_space<vmem>>, vector<1x8x128xf32>,
    } else {
    }
    %true = arith.constant true
    %44 = arith.xori %41, %true : i1
    %45 = arith.extui %44 : i1 to i32
    %c0_i32_19 = arith.constant 0 : i32
    %46 = arith.cmpi ne, %45, %c0_i32_19 : i32
    scf.if %46 {
      %c0_23 = arith.constant 0 : index
      %c0_24 = arith.constant 0 : index
      %c0_25 = arith.constant 0 : index
      %54 = vector.load %arg7[%c0_23, %c0_24, %c0_25] : memref<1x8x128xf32, #tpu.memory_space<vmem>>, vector<1x8x128xf32>
      %55 = vector.shape_cast %22 : vector<8x128xf32> to vector<1x8x128xf32>
      %cst_26 = arith.constant dense<0.000000e+00> : vector<1xf32>
      %56 = vector.multi_reduction <add>, %55, %cst_26 [1, 2] : vector<1x8x128xf32> to vector<1xf32>
      %57 = vector.shape_cast %56 : vector<1xf32> to vector<1x1x1xf32>
      %58 = vector.extract %57[0, 0, 0] : f32 from vector<1x1x1xf32>
      %cst_27 = arith.constant 0.000000e+00 : f32
      %59 = vector.broadcast %58 : f32 to vector<1x8x128xf32>
      %60 = vector.broadcast %cst_27 : f32 to vector<1x8x128xf32>
      %61 = arith.select %31, %59, %60 : vector<1x8x128xi1>, vector<1x8x128xf32>
      %62 = arith.addf %54, %61 : vector<1x8x128xf32>
      %c0_28 = arith.constant 0 : index
      %c0_29 = arith.constant 0 : index
      %c0_30 = arith.constant 0 : index
      %63 = vector.load %arg7[%c0_28, %c0_29, %c0_30] : memref<1x8x128xf32, #tpu.memory_space<vmem>>, vector<1x8x128xf32>
      tpu.vector_store %arg7[%c0_28, %c0_29, %c0_30], %62 {strides = array<i32>} : memref<1x8x128xf32, #tpu.memory_space<vmem>>, vector<1x8x128xf32>,
    } else {
    }
    %c128_i32_20 = arith.constant 128 : i32
    %47 = arith.addi %24, %c128_i32_20 : i32
    %48 = arith.cmpi slt, %23, %47 : i32
    %c8_i32_21 = arith.constant 8 : i32
    %49 = arith.addi %23, %c8_i32_21 : i32
    %50 = arith.cmpi slt, %24, %49 : i32
    %51 = arith.andi %48, %50 : i1
    %52 = arith.extui %51 : i1 to i32
    %c0_i32_22 = arith.constant 0 : i32
    %53 = arith.cmpi ne, %52, %c0_i32_22 : i32
    scf.if %53 {
      %54 = tpu.iota {dimensions = array<i32: 0>} : vector<8x128xi32>
      %55 = vector.broadcast %23 : i32 to vector<8x128xi32>
      %56 = arith.addi %55, %54 : vector<8x128xi32>
      %57 = tpu.iota {dimensions = array<i32: 1>} : vector<8x128xi32>
      %58 = vector.broadcast %24 : i32 to vector<8x128xi32>
      %59 = arith.addi %58, %57 : vector<8x128xi32>
      %60 = arith.cmpi eq, %56, %59 : vector<8x128xi32>
      %c8_i32_23 = arith.constant 8 : i32
      %61 = vector.broadcast %c8_i32_23 : i32 to vector<8x128xi32>
      %62 = arith.cmpi slt, %56, %61 : vector<8x128xi32>
      %63 = arith.andi %60, %62 : vector<8x128xi1>
      %cst_24 = arith.constant 0.000000e+00 : f32
      %64 = vector.broadcast %cst_24 : f32 to vector<8x128xf32>
      %65 = arith.select %63, %14, %64 : vector<8x128xi1>, vector<8x128xf32>
      %66 = vector.shape_cast %65 : vector<8x128xf32> to vector<1x8x128xf32>
      %cst_25 = arith.constant dense<0.000000e+00> : vector<1xf32>
      %67 = vector.multi_reduction <add>, %66, %cst_25 [1, 2] : vector<1x8x128xf32> to vector<1xf32>
      %68 = vector.shape_cast %67 : vector<1xf32> to vector<1x1x1xf32>
      %69 = vector.extract %68[0, 0, 0] : f32 from vector<1x1x1xf32>
      %c0_26 = arith.constant 0 : index
      %c0_27 = arith.constant 0 : index
      %c0_28 = arith.constant 0 : index
      %70 = vector.load %arg7[%c0_26, %c0_27, %c0_28] : memref<1x8x128xf32, #tpu.memory_space<vmem>>, vector<1x8x128xf32>
      %cst_29 = arith.constant 0.000000e+00 : f32
      %71 = vector.broadcast %69 : f32 to vector<1x8x128xf32>
      %72 = vector.broadcast %cst_29 : f32 to vector<1x8x128xf32>
      %73 = arith.select %36, %71, %72 : vector<1x8x128xi1>, vector<1x8x128xf32>
      %74 = arith.addf %70, %73 : vector<1x8x128xf32>
      %c0_30 = arith.constant 0 : index
      %c0_31 = arith.constant 0 : index
      %c0_32 = arith.constant 0 : index
      %75 = vector.load %arg7[%c0_30, %c0_31, %c0_32] : memref<1x8x128xf32, #tpu.memory_space<vmem>>, vector<1x8x128xf32>
      tpu.vector_store %arg7[%c0_30, %c0_31, %c0_32], %74 {strides = array<i32>} : memref<1x8x128xf32, #tpu.memory_space<vmem>>, vector<1x8x128xf32>,
    } else {
    }
    return
  }
  func.func @transform_0(%arg0: i32, %arg1: i32) -> i32 {
    %c0_i32 = arith.constant 0 : i32
    %c0_i32_0 = arith.constant 0 : i32
    return %c0_i32 : i32
  }
  func.func @transform_1(%arg0: i32, %arg1: i32) -> (i32, i32) {
    %c0_i32 = arith.constant 0 : i32
    %c0_i32_0 = arith.constant 0 : i32
    return %arg0, %c0_i32 : i32, i32
  }
  func.func @transform_2(%arg0: i32, %arg1: i32) -> (i32, i32) {
    %c0_i32 = arith.constant 0 : i32
    %c0_i32_0 = arith.constant 0 : i32
    return %arg1, %c0_i32 : i32, i32
  }
  func.func @transform_3(%arg0: i32, %arg1: i32) -> (i32, i32) {
    %c0_i32 = arith.constant 0 : i32
    %c0_i32_0 = arith.constant 0 : i32
    return %arg0, %c0_i32 : i32, i32
  }
  func.func @transform_4(%arg0: i32, %arg1: i32) -> (i32, i32) {
    %c0_i32 = arith.constant 0 : i32
    %c0_i32_0 = arith.constant 0 : i32
    return %c0_i32, %arg1 : i32, i32
  }
  func.func @transform_5(%arg0: i32, %arg1: i32) -> (i32, i32, i32) {
    %c0_i32 = arith.constant 0 : i32
    %c0_i32_0 = arith.constant 0 : i32
    %c0_i32_1 = arith.constant 0 : i32
    return %arg0, %c0_i32, %c0_i32_0 : i32, i32, i32
  }
}

</mosaic_0001>

<bundles_post_ra>
// kernel: pcmepp_closed_form_loss.1
= control target key start
LH: loop header
LB: loop body
LE: loop exit
PB: predicated region body
PF: predicated region fallthrough
CT: control target
= control target key end

     0   :  { %v1286_v0 = vmov 0.0|0.0   ;;  %vm1287_vm0 = vmmov 0   ;;  %v1288_v5 = vmov 0.0   ;;  %s1598_s2 = inlined_call_operand.vmem [shape: f32[128,128], index: 2, kind: input, shape index: {}]   ;;  %s1599_s1 = inlined_call_operand.vmem [shape: f32[8,128], index: 1, kind: input, shape index: {}]   ;;  %s1600_s3 = inlined_call_operand.vmem [shape: f32[8,1], index: 3, kind: input, shape index: {}]   ;;  %s1601_s0 = inlined_call_operand.<no memory space> [shape: f32[1], index: 0, kind: input, shape index: {}]   ;;  %s1602_s4 = inlined_call_operand.vmem [shape: f32[1,128], index: 4, kind: input, shape index: {}]   ;;  %s1603_s5 = inlined_call_operand.vmem [shape: f32[1,8,128], index: 5, kind: output, shape index: {}]  }
   0x1   :  { %1120 = vmatprep.subr.bf16.mxu1 %v1286_v0  ;;  %1192 = vmatprep.subr.bf16.mxu0 %v1286_v0  ;;  %v27_v1 = vld [vmem:[%s1598_s2] sm:$0xff]  ;;  %v28_v2 = vld [vmem:[%s1598_s2 + $0x8] sm:$0xff]  ;;  %v29_v6 = vld [vmem:[%s1598_s2 + $0x10] sm:$0xff] }
   0x2   :  { %v44_v3 = vand.u32 4294901760, %v27_v1  ;;  %v47_v4 = vand.u32 4294901760, %v28_v2  ;;  %942 = vmatprep.mubr.msk.f32.mxu1 %vm1287_vm0, %v1288_v5  ;;  %1047 = vmatprep.mubr.msk.f32.mxu0 %vm1287_vm0, %v1288_v5  ;;  %v30_v7 = vld [vmem:[%s1598_s2 + $0x18] sm:$0xff]  ;;  %v50_v9 = vand.u32 4294901760, %v29_v6  ;;  %v31_v12 = vld [vmem:[%s1598_s2 + $0x20] sm:$0xff]  ;;  %v32_v13 = vld [vmem:[%s1598_s2 + $0x28] sm:$0xff] }
   0x3   :  { %v53_v10 = vand.u32 4294901760, %v30_v7  ;;  %v56_v14 = vand.u32 4294901760, %v31_v12  ;;  %v59_v15 = vand.u32 4294901760, %v32_v13  ;;  %v33_v17 = vld [vmem:[%s1598_s2 + $0x30] sm:$0xff]  ;;  %v34_v18 = vld [vmem:[%s1598_s2 + $0x38] sm:$0xff]  ;;  %v35_v23 = vld [vmem:[%s1598_s2 + $0x40] sm:$0xff] }
   0x4   :  { %v1338_v8 = vpack.c.bf16 %v47_v4, %v44_v3  ;;  %v62_v19 = vand.u32 4294901760, %v33_v17  ;;  %v65_v20 = vand.u32 4294901760, %v34_v18  ;;  %v1368_v21 = vsub.f32 %v27_v1, %v44_v3  ;;  %v36_v24 = vld [vmem:[%s1598_s2 + $0x48] sm:$0xff]  ;;  %v37_v41 = vld [vmem:[%s1598_s2 + $0x50] sm:$0xff]  ;;  %v38_v42 = vld [vmem:[%s1598_s2 + $0x58] sm:$0xff] }
   0x5   :  { %v1344_v11 = vpack.c.bf16 %v53_v10, %v50_v9  ;;  %v1356_v16 = vpack.c.bf16 %v59_v15, %v56_v14  ;;  %v1370_v22 = vsub.f32 %v28_v2, %v47_v4  ;;  %v1378_v25 = vsub.f32 %v29_v6, %v50_v9  ;;  %v39_v49 = vld [vmem:[%s1598_s2 + $0x60] sm:$0xff]  ;;  %v40_v50 = vld [vmem:[%s1598_s2 + $0x68] sm:$0xff]  ;;  %v41_v58 = vld [vmem:[%s1598_s2 + $0x70] sm:$0xff] }
   0x6   :  { %1122 = vmatpush3.bf16.xpose.msra.mxu1 %v1338_v8  ;;  %1194 = vmatpush3.bf16.xpose.msra.mxu0 %v1338_v8  ;;  %v1380_v26 = vsub.f32 %v30_v7, %v53_v10  ;;  %v1382_v27 = vsub.f32 %v31_v12, %v56_v14  ;;  %v1384_v28 = vsub.f32 %v32_v13, %v59_v15  ;;  %v68_v33 = vand.u32 4294901760, %v35_v23  ;;  %v26_v56 = vld [vmem:[%s1599_s1] sm:$0xff]  ;;  %v42_v59 = vld [vmem:[%s1598_s2 + $0x78] sm:$0xff] }
   0x7   :  { %1123 = vmatprep.subr.bf16.mxu1 %v1286_v0  ;;  %1195 = vmatprep.subr.bf16.mxu0 %v1286_v0  ;;  %v1386_v29 = vpack.c.bf16 %v65_v20, %v62_v19  ;;  %v1169_v30 = vpack.c.bf16 %v1370_v22, %v1368_v21  ;;  %v1390_v31 = vsub.f32 %v33_v17, %v62_v19  ;;  %v71_v34 = vand.u32 4294901760, %v36_v24 }
   0x8   :  { %v1392_v32 = vsub.f32 %v34_v18, %v65_v20  ;;  %v1172_v35 = vpack.c.bf16 %v1380_v26, %v1378_v25  ;;  %v1396_v36 = vsub.f32 %v35_v23, %v68_v33  ;;  %v1175_v38 = vpack.c.bf16 %v1384_v28, %v1382_v27 }
   0x9   :  { %v1398_v37 = vsub.f32 %v36_v24, %v71_v34  ;;  %v1416_v43 = vpack.c.bf16 %v71_v34, %v68_v33  ;;  %v74_v44 = vand.u32 4294901760, %v37_v41  ;;  %v77_v45 = vand.u32 4294901760, %v38_v42 }
   0xa   :  { %v1178_v39 = vpack.c.bf16 %v1392_v32, %v1390_v31  ;;  %v80_v52 = vand.u32 4294901760, %v39_v49  ;;  %v83_v53 = vand.u32 4294901760, %v40_v50  ;;  %v1455_v60 = vand.u32 4294901760, %v26_v56 }
   0xb   :  { %v1181_v40 = vpack.c.bf16 %v1398_v37, %v1396_v36  ;;  %v1418_v46 = vsub.f32 %v37_v41, %v74_v44  ;;  %v1420_v47 = vsub.f32 %v38_v42, %v77_v45  ;;  %v1434_v51 = vpack.c.bf16 %v77_v45, %v74_v44 }
   0xc   :  { %v1436_v54 = vsub.f32 %v39_v49, %v80_v52  ;;  %v1438_v55 = vsub.f32 %v40_v50, %v83_v53  ;;  %v1457_v61 = vpack.c.bf16 %v83_v53, %v80_v52  ;;  %v86_v62 = vand.u32 4294901760, %v41_v58  ;;  %v687_v49 = vld [vmem:[%s1600_s3] sm:$0xff] }
   0xd   :  { %v1184_v48 = vpack.c.bf16 %v1420_v47, %v1418_v46  ;;  %v89_v63 = vand.u32 4294901760, %v42_v59  ;;  %v1464_v3 = vsub.f32 %v26_v56, %v1455_v60  ;;  %v137_v4 = vand.u32 4294901760, %v1368_v21 }
   0xe   :  { %1125 = vmatpush3.bf16.xpose.msra.mxu1 %v1344_v11  ;;  %1197 = vmatpush3.bf16.xpose.msra.mxu0 %v1344_v11  ;;  %v1187_v57 = vpack.c.bf16 %v1438_v55, %v1436_v54  ;;  %v1459_v1 = vsub.f32 %v41_v58, %v86_v62  ;;  %v144_v6 = vand.u32 4294901760, %v1370_v22  ;;  %v151_v18 = vand.u32 4294901760, %v1378_v25 }
   0xf   :  { %1126 = vmatprep.subr.bf16.mxu1 %v1286_v0  ;;  %1198 = vmatprep.subr.bf16.mxu0 %v1286_v0  ;;  %v1461_v2 = vsub.f32 %v42_v59, %v89_v63  ;;  %v126_v9 = vand.u32 4294901760, %v1464_v3  ;;  %v1475_v10 = vpack.c.bf16 %v89_v63, %v86_v62  ;;  %v138_v12 = vsub.f32 %v1368_v21, %v137_v4 }
  0x10   :  { %v145_v13 = vsub.f32 %v1370_v22, %v144_v6  ;;  %v158_v19 = vand.u32 4294901760, %v1380_v26  ;;  %v1217_v24 = vpack.c.bf16 %v144_v6, %v137_v4  ;;  %v152_v33 = vsub.f32 %v1378_v25, %v151_v18 }
  0x11   :  { %v1190_v7 = vpack.c.bf16 %v1461_v2, %v1459_v1  ;;  %v127_v14 = vsub.f32 %v1464_v3, %v126_v9  ;;  %v139_v15 = vand.u32 4294901760, %v138_v12  ;;  %v165_v41 = vand.u32 4294901760, %v1382_v27 }
  0x12   :  { %v146_v17 = vand.u32 4294901760, %v145_v13  ;;  %v159_v34 = vsub.f32 %v1380_v26, %v158_v19  ;;  %v153_v42 = vand.u32 4294901760, %v152_v33  ;;  %v172_v45 = vand.u32 4294901760, %v1384_v28 }
  0x13   :  { %v128_v20 = vand.u32 4294901760, %v127_v14  ;;  %v1289_v50 = vmov 0   ;;  %v1220_v53 = vpack.c.bf16 %v158_v19, %v151_v18  ;;  %v166_v56 = vsub.f32 %v1382_v27, %v165_v41 }
  0x14   :  { %v1145_v23 = vpack.c.bf16 %v146_v17, %v139_v15  ;;  %v160_v44 = vand.u32 4294901760, %v159_v34  ;;  %1281 = vset.pattern.permute.xlu0 %v1289_v50  ;;  %v173_v58 = vsub.f32 %v1384_v28, %v172_v45  ;;  %v179_v63 = vand.u32 4294901760, %v1390_v31 }
  0x15   :  { %690 = vperm.xlu0 %1281, %v687_v49   ;;  %v167_v59 = vand.u32 4294901760, %v166_v56  ;;  %v186_v4 = vand.u32 4294901760, %v1392_v32  ;;  %v193_v17 = vand.u32 4294901760, %v1396_v36  ;;  %v200_v18 = vand.u32 4294901760, %v1398_v37 }
  0x16   :  { %1128 = vmatpush3.bf16.xpose.msra.mxu1 %v1356_v16  ;;  %1200 = vmatpush3.bf16.xpose.msra.mxu0 %v1356_v16  ;;  %v1148_v52 = vpack.c.bf16 %v160_v44, %v153_v42  ;;  %v174_v62 = vand.u32 4294901760, %v173_v58  ;;  %v180_v12 = vsub.f32 %v1390_v31, %v179_v63  ;;  %v214_v42 = vand.u32 4294901760, %v1420_v47 }
  0x17   :  { %1129 = vmatprep.subr.bf16.mxu1 %v1286_v0  ;;  %1201 = vmatprep.subr.bf16.mxu0 %v1286_v0  ;;  %v187_v13 = vsub.f32 %v1392_v32, %v186_v4  ;;  %v221_v56 = vand.u32 4294901760, %v1436_v54  ;;  %v228_v58 = vand.u32 4294901760, %v1438_v55 }
  0x18   :  { %v1151_v6 = vpack.c.bf16 %v174_v62, %v167_v59  ;;  %v181_v14 = vand.u32 4294901760, %v180_v12  ;;  %v215_v50 = vsub.f32 %v1420_v47, %v214_v42  ;;  %v235_v12 = vand.u32 4294901760, %v1459_v1 }
  0x19   :  { %v188_v15 = vand.u32 4294901760, %v187_v13  ;;  %v242_v13 = vand.u32 4294901760, %v1461_v2 }
  0x1b   :  { %v1154_v19 = vpack.c.bf16 %v188_v15, %v181_v14  ;;  %v1235_v15 = vpack.c.bf16 %v228_v58, %v221_v56 }
  0x1e   :  { %1131 = vmatpush3.bf16.xpose.msra.mxu1 %v1386_v29  ;;  %1203 = vmatpush3.bf16.xpose.msra.mxu0 %v1386_v29 }
  0x1f   :  { %1132 = vmatprep.subr.bf16.mxu1 %v1286_v0  ;;  %1204 = vmatprep.subr.bf16.mxu0 %v1286_v0 }
  0x26   :  { %1134 = vmatpush3.bf16.xpose.msra.mxu1 %v1416_v43  ;;  %1206 = vmatpush3.bf16.xpose.msra.mxu0 %v1416_v43 }
  0x27   :  { %1135 = vmatprep.subr.bf16.mxu1 %v1286_v0  ;;  %1207 = vmatprep.subr.bf16.mxu0 %v1286_v0 }
  0x2e   :  { %1137 = vmatpush3.bf16.xpose.msra.mxu1 %v1434_v51  ;;  %1209 = vmatpush3.bf16.xpose.msra.mxu0 %v1434_v51 }
  0x2f   :  { %1138 = vmatprep.subr.bf16.mxu1 %v1286_v0  ;;  %1210 = vmatprep.subr.bf16.mxu0 %v1286_v0 }
  0x36   :  { %1140 = vmatpush3.bf16.xpose.msra.mxu1 %v1457_v61  ;;  %1212 = vmatpush3.bf16.xpose.msra.mxu0 %v1457_v61 }
  0x37   :  { %1141 = vmatprep.subr.bf16.mxu1 %v1286_v0  ;;  %1213 = vmatprep.subr.bf16.mxu0 %v1286_v0 }
  0x3e   :  { %1143 = vmatpush3.bf16.xpose.msra.mxu1 %v1475_v10  ;;  %1215 = vmatpush3.bf16.xpose.msra.mxu0 %v1475_v10 }
  0x3f   :  { %1144 = vmatprep.subr.bf16.mxu1 %v1286_v0  ;;  %1216 = vmatprep.subr.bf16.mxu0 %v1286_v0 }
  0x45   :  { %943 = vmatmul.mubr.f32.vlgmr.msra.gmra.mrb[0].mxu1 %v128_v20  ;;  %1048 = vmatmul.mubr.f32.vlgmr.msra.gmra.mrb[0].mxu0 %v126_v9  ;;  %v1223_v9 = vpack.c.bf16 %v172_v45, %v165_v41  ;;  %v1226_v20 = vpack.c.bf16 %v186_v4, %v179_v63  ;;  %v207_v41 = vand.u32 4294901760, %v1418_v46  ;;  %v1229_v45 = vpack.c.bf16 %v200_v18, %v193_v17 }
  0x46   :  { %1146 = vmatpush3.bf16.xpose.msra.mxu1 %v1145_v23  ;;  %1218 = vmatpush3.bf16.xpose.msra.mxu0 %v1217_v24  ;;  %v194_v23 = vsub.f32 %v1396_v36, %v193_v17  ;;  %v201_v24 = vsub.f32 %v1398_v37, %v200_v18  ;;  %v222_v63 = vsub.f32 %v1436_v54, %v221_v56 }
  0x47   :  { %1147 = vmatprep.subr.bf16.mxu1 %v1286_v0  ;;  %1219 = vmatprep.subr.bf16.mxu0 %v1286_v0  ;;  %v208_v49 = vsub.f32 %v1418_v46, %v207_v41  ;;  %v1232_v62 = vpack.c.bf16 %v214_v42, %v207_v41  ;;  %v229_v4 = vsub.f32 %v1438_v55, %v228_v58 }
  0x48   :  { %977 = vmatprep.mubr.msk.f32.mxu1 %vm1287_vm0, %v1288_v5  ;;  %1082 = vmatprep.mubr.msk.f32.mxu0 %vm1287_vm0, %v1288_v5  ;;  %v195_v33 = vand.u32 4294901760, %v194_v23  ;;  %v202_v34 = vand.u32 4294901760, %v201_v24  ;;  %v236_v17 = vsub.f32 %v1459_v1, %v235_v12  ;;  %v243_v18 = vsub.f32 %v1461_v2, %v242_v13 }
  0x49   :  { %v1238_v24 = vpack.c.bf16 %v242_v13, %v235_v12 }
  0x4a   :  { %v1157_v44 = vpack.c.bf16 %v202_v34, %v195_v33 }
  0x4e   :  { %1149 = vmatpush3.bf16.xpose.msra.mxu1 %v1148_v52  ;;  %1221 = vmatpush3.bf16.xpose.msra.mxu0 %v1220_v53  ;;  %v209_v52 = vand.u32 4294901760, %v208_v49  ;;  %v216_v53 = vand.u32 4294901760, %v215_v50 }
  0x4f   :  { %1150 = vmatprep.subr.bf16.mxu1 %v1286_v0  ;;  %1222 = vmatprep.subr.bf16.mxu0 %v1286_v0 }
  0x50   :  { %v1160_v59 = vpack.c.bf16 %v216_v53, %v209_v52 }
  0x56   :  { %1152 = vmatpush3.bf16.xpose.msra.mxu1 %v1151_v6  ;;  %1224 = vmatpush3.bf16.xpose.msra.mxu0 %v1223_v9  ;;  %v223_v6 = vand.u32 4294901760, %v222_v63  ;;  %v230_v9 = vand.u32 4294901760, %v229_v4 }
  0x57   :  { %1153 = vmatprep.subr.bf16.mxu1 %v1286_v0  ;;  %1225 = vmatprep.subr.bf16.mxu0 %v1286_v0 }
  0x58   :  { %v1163_v14 = vpack.c.bf16 %v230_v9, %v223_v6 }
  0x5e   :  { %1155 = vmatpush3.bf16.xpose.msra.mxu1 %v1154_v19  ;;  %1227 = vmatpush3.bf16.xpose.msra.mxu0 %v1226_v20  ;;  %v237_v19 = vand.u32 4294901760, %v236_v17  ;;  %v244_v20 = vand.u32 4294901760, %v243_v18 }
  0x5f   :  { %1156 = vmatprep.subr.bf16.mxu1 %v1286_v0  ;;  %1228 = vmatprep.subr.bf16.mxu0 %v1286_v0 }
  0x60   :  { %v1166_v23 = vpack.c.bf16 %v244_v20, %v237_v19 }
  0x66   :  { %1158 = vmatpush3.bf16.xpose.msra.mxu1 %v1157_v44  ;;  %1230 = vmatpush3.bf16.xpose.msra.mxu0 %v1229_v45 }
  0x67   :  { %1159 = vmatprep.subr.bf16.mxu1 %v1286_v0  ;;  %1231 = vmatprep.subr.bf16.mxu0 %v1286_v0 }
  0x6e   :  { %1161 = vmatpush3.bf16.xpose.msra.mxu1 %v1160_v59  ;;  %1233 = vmatpush3.bf16.xpose.msra.mxu0 %v1232_v62 }
  0x6f   :  { %1162 = vmatprep.subr.bf16.mxu1 %v1286_v0  ;;  %1234 = vmatprep.subr.bf16.mxu0 %v1286_v0 }
  0x76   :  { %1164 = vmatpush3.bf16.xpose.msra.mxu1 %v1163_v14  ;;  %1236 = vmatpush3.bf16.xpose.msra.mxu0 %v1235_v15 }
  0x77   :  { %1165 = vmatprep.subr.bf16.mxu1 %v1286_v0  ;;  %1237 = vmatprep.subr.bf16.mxu0 %v1286_v0 }
  0x7e   :  { %1167 = vmatpush3.bf16.xpose.msra.mxu1 %v1166_v23  ;;  %1239 = vmatpush3.bf16.xpose.msra.mxu0 %v1238_v24 }
  0x7f   :  { %1168 = vmatprep.subr.bf16.mxu1 %v1286_v0  ;;  %1240 = vmatprep.subr.bf16.mxu0 %v1286_v0 }
  0x85   :  { %978 = vmatmul.mubr.f32.vlgmr.msra.gmra.mrb[0].mxu1 %v1455_v60  ;;  %1083 = vmatmul.mubr.f32.vlgmr.msra.gmra.mrb[0].mxu0 %v1455_v60 }
  0x86   :  { %1170 = vmatpush3.bf16.xpose.msra.mxu1 %v1169_v30  ;;  %1242 = vmatpush3.bf16.xpose.msra.mxu0 %v1338_v8 }
  0x87   :  { %1171 = vmatprep.subr.bf16.mxu1 %v1286_v0  ;;  %1243 = vmatprep.subr.bf16.mxu0 %v1286_v0 }
  0x88   :  { %1012 = vmatprep.mubr.msk.f32.mxu1 %vm1287_vm0, %v1288_v5  ;;  %1117 = vmatprep.mubr.msk.f32.mxu0 %vm1287_vm0, %v1288_v5  ;;  %v719_v5 = vlaneseq }
  0x8a   :  { %v720_v26 = vshrl.u32 %v719_v5, 7  ;;  %v722_v27 = vand.u32 127, %v719_v5 }
  0x8c   :  { %vm785_vm1 = vcmp.eq.s32.totalorder %v720_v26, %v722_v27  ;;  %vm741_vm3 = vcmp.lt.s32.totalorder %v722_v27, 8  ;;  %vm723_vm4 = vcmp.eq.s32.totalorder %v720_v26, 0  ;;  %vm724_vm5 = vcmp.eq.s32.totalorder %v722_v27, 0 }
  0x8d   :  { %vm726_vm6 = vcmp.eq.s32.totalorder %v722_v27, 1  ;;  %vm725_vm7 = vmand %vm723_vm4, %vm724_vm5 }
  0x8e   :  { %1173 = vmatpush3.bf16.xpose.msra.mxu1 %v1172_v35  ;;  %1245 = vmatpush3.bf16.xpose.msra.mxu0 %v1344_v11  ;;  %vm727_vm8 = vmand %vm723_vm4, %vm726_vm6 }
  0x8f   :  { %1174 = vmatprep.subr.bf16.mxu1 %v1286_v0  ;;  %1246 = vmatprep.subr.bf16.mxu0 %v1286_v0 }
  0x94   :  { %v691_v25 = vpop.permute.xlu0 %690 }
  0x96   :  { %1176 = vmatpush3.bf16.xpose.msra.mxu1 %v1175_v38  ;;  %1248 = vmatpush3.bf16.xpose.msra.mxu0 %v1356_v16  ;;  %v685_v16 = vstv %s1601_s0 }
  0x97   :  { %1177 = vmatprep.subr.bf16.mxu1 %v1286_v0  ;;  %1249 = vmatprep.subr.bf16.mxu0 %v1286_v0 }
  0x9e   :  { %1179 = vmatpush3.bf16.xpose.msra.mxu1 %v1178_v39  ;;  %1251 = vmatpush3.bf16.xpose.msra.mxu0 %v1386_v29  ;;  %v807_v29 = vld [vmem:[%s1602_s4] ss:$0 sm:$0xff] }
  0x9f   :  { %1180 = vmatprep.subr.bf16.mxu1 %v1286_v0  ;;  %1252 = vmatprep.subr.bf16.mxu0 %v1286_v0 }
  0xa6   :  { %1182 = vmatpush3.bf16.xpose.msra.mxu1 %v1181_v40  ;;  %1254 = vmatpush3.bf16.xpose.msra.mxu0 %v1416_v43 }
  0xa7   :  { %1183 = vmatprep.subr.bf16.mxu1 %v1286_v0  ;;  %1255 = vmatprep.subr.bf16.mxu0 %v1286_v0 }
  0xae   :  { %1185 = vmatpush3.bf16.xpose.msra.mxu1 %v1184_v48  ;;  %1257 = vmatpush3.bf16.xpose.msra.mxu0 %v1434_v51 }
  0xaf   :  { %1186 = vmatprep.subr.bf16.mxu1 %v1286_v0  ;;  %1258 = vmatprep.subr.bf16.mxu0 %v1286_v0 }
  0xb6   :  { %1188 = vmatpush3.bf16.xpose.msra.mxu1 %v1187_v57  ;;  %1260 = vmatpush3.bf16.xpose.msra.mxu0 %v1457_v61 }
  0xb7   :  { %1189 = vmatprep.subr.bf16.mxu1 %v1286_v0  ;;  %1261 = vmatprep.subr.bf16.mxu0 %v1286_v0 }
  0xbe   :  { %1191 = vmatpush3.bf16.xpose.msra.mxu1 %v1190_v7  ;;  %1263 = vmatpush3.bf16.xpose.msra.mxu0 %v1475_v10 }
  0xc5   :  { %1013 = vmatmul.mubr.f32.vlgmr.msra.gmra.mrb[0].mxu1 %v1464_v3  ;;  %1118 = vmatmul.mubr.f32.vlgmr.msra.gmra.mrb[0].mxu0 %v1455_v60 }
 0x198   :  { %v385_v8 = vpop.f32.mrb[0].mxu1  ;;  %v680_v11 = vpop.f32.mrb[0].mxu0 }
 0x199   :  { %v1264_v21 = vadd.f32 %v680_v11, %v385_v8  ;;  %v1014_v22 = vpop.f32.mrb[1].mxu1  ;;  %v1119_v0 = vpop.f32.mrb[1].mxu0 }
 0x19b   :  { %v686_v28 = vmul.f32 %v1264_v21, %v685_v16 }
 0x19d   :  { %v693_v30 = vadd.f32 %v691_v25, %v686_v28 }
 0x19f   :  { %v701_v31 = vadd.f32 %v807_v29, %v693_v30 }
 0x1a1   :  { %v703_v32 = vand.u32 2147483647, %v701_v31  ;;  %v788_v35 = vsel %vm785_vm1, %v701_v31, 0.0  ;;  %v702_v54 = vmax.f32 %v701_v31, 0.0 }
 0x1a2   :  { %789 = vadd.xlane.f32.xlu1 %v788_v35 }
 0x1a3   :  { %v704_v36 = vsub.f32 0.0, %v703_v32 }
 0x1a5   :  { %v705_v37 = vmul.f32 1.442695, %v704_v36 }
 0x1a7   :  { %1282 = vpow2.f32 %v705_v37 }
 0x1b1   :  { %v1283_v38 = vpop.eup %1282 }
 0x1b2   :  { %v707_v39 = vadd.f32 1.0, %v1283_v38  ;;  %v710_v40 = vmul.f32 -0.5, %v1283_v38  ;;  %v713_v46 = vand.u32 2147483647, %v1283_v38 }
 0x1b4   :  { %1284 = vlog2.f32 %v707_v39  ;;  %v711_v43 = vadd.f32 1.0, %v710_v40  ;;  %vm714_vm2 = vcmp.lt.f32.partialorder %v713_v46, 0.0004427343 }
 0x1b6   :  { %v712_v51 = vmul.f32 %v1283_v38, %v711_v43 }
 0x1be   :  { %v1285_v47 = vpop.eup %1284 }
 0x1bf   :  { %v709_v48 = vmul.f32 0.6931472, %v1285_v47 }
 0x1c1   :  { %v715_v55 = vsel %vm714_vm2, %v712_v51, %v709_v48 }
 0x1c2   :  { %v716_v57 = vadd.f32 %v715_v55, %v702_v54 }
 0x1c4   :  { %v743_v60 = vsel %vm741_vm3, %v716_v57, 0.0 }
 0x1c5   :  { %744 = vadd.xlane.f32.xlu0 %v743_v60 }
 0x22f   :  { %v790_v61 = vpop.xlane.xlu1 %789 }
 0x230   :  { %v791_v1 = vrot.slane %v790_v61, 4 }
 0x232   :  { %v792_v2 = vadd.f32 %v791_v1, %v790_v61 }
 0x234   :  { %v793_v3 = vrot.slane %v792_v2, 2 }
 0x236   :  { %v794_v34 = vadd.f32 %v793_v3, %v792_v2 }
 0x238   :  { %v795_v44 = vrot.slane %v794_v34, 1 }
 0x23a   :  { %v796_v50 = vadd.f32 %v795_v44, %v794_v34 }
 0x252   :  { %v745_v7 = vpop.xlane.xlu0 %744 }
 0x253   :  { %v746_v10 = vrot.slane %v745_v7, 4 }
 0x255   :  { %v747_v33 = vadd.f32 %v746_v10, %v745_v7 }
 0x257   :  { %v748_v41 = vrot.slane %v747_v33, 2 }
 0x259   :  { %v749_v42 = vadd.f32 %v748_v41, %v747_v33 }
 0x25b   :  { %v750_v45 = vrot.slane %v749_v42, 1 }
 0x25d   :  { %v751_v49 = vadd.f32 %v750_v45, %v749_v42 }
 0x25f   :  { %1273 = vpush %v751_v49 }
 0x260   :  { %1275 = vpush %v796_v50 }
 0x290   :  { %s1274_s0 = spop %1273 }
 0x291   :  { %v754_v52 = vstv %s1274_s0  ;;  %s1276_s4 = spop %1275 }
 0x292   :  { %v755_v53 = vsel %vm725_vm7, %v754_v52, 0.0  ;;  %v799_v56 = vstv %s1276_s4 }
 0x293   :  { %v800_v58 = vsel %vm727_vm8, %v799_v56, 0.0 }
 0x294   :  { %v801_v59 = vadd.f32 %v800_v58, %v755_v53 }
 0x296   :  { %802 = vst [vmem:[%s1603_s5] sm:$0xff] %v801_v59 }

</bundles_post_ra>
